<compile_context>
chip_gen: v6e
topology: v6e:2x2x1
jax: 0.10.0
libtpu: 0.0.40
codegen_flags: <defaults>
</compile_context>

<pallas_src>
import functools

import numpy as np

import jax
import jax.numpy as jnp
from jax.experimental import pallas as pl
from jax.experimental.pallas import tpu as pltpu

# ----------------------------- config ---------------------------------------
PATCH_NUM_WIDTH = 4
PATCH_NUM_HEIGHT = 4
MAX_PATCHES = PATCH_NUM_WIDTH * PATCH_NUM_HEIGHT          # 16
HIDDEN = 128                                              # POSITION_EMBEDDING_LENGTH (scaled, lane-dense)
NUM_CHANNELS = 3
PATCH_SIZE = 4
IMAGE_SIZE = PATCH_NUM_WIDTH * PATCH_SIZE                 # 16
SEQ = MAX_PATCHES + 1                                     # 17 (cls + patches)
SEQ_PAD = ((SEQ + 7) // 8) * 8                            # 24 (sublane aligned)
PATCH_DIM = NUM_CHANNELS * PATCH_SIZE * PATCH_SIZE        # 48 (im2col K)
K_POS = SEQ + 1                                           # 18 ([class_emb; pos_table] rows)
K_TOTAL = PATCH_DIM + K_POS                               # 66
K_PAD = ((K_TOTAL + 127) // 128) * 128                    # 128 (lane aligned)


# --------------------- host-side bicubic mixing rows ------------------------
def _cubic_resize_matrix(in_size, out_size, A=-0.75):
    """Dense [out_size, in_size] matrix reproducing torch bicubic
    (align_corners=False, a=-0.75), with edge-clamped taps."""
    def W1(d):   # |d| <= 1
        return (A + 2.0) * d ** 3 - (A + 3.0) * d ** 2 + 1.0

    def W2(d):   # 1 < |d| < 2
        return A * d ** 3 - 5.0 * A * d ** 2 + 8.0 * A * d - 4.0 * A

    M = np.zeros((out_size, in_size), dtype=np.float32)
    scale = in_size / out_size
    for i in range(out_size):
        src = (i + 0.5) * scale - 0.5
        i0 = int(np.floor(src))
        t = src - i0
        weights = [W2(1.0 + t), W1(t), W1(1.0 - t), W2(2.0 - t)]
        for off, wgt in zip(range(-1, 3), weights):
            idx = min(max(i0 + off, 0), in_size - 1)
            M[i, idx] += wgt
    return M


@functools.lru_cache(maxsize=None)
def _position_mixing_rows(w_patch_num, h_patch_num):
    """[SEQ_PAD, K_POS] matrix M such that
         M @ concat([class_embedding, pos_table])  ==
           class_embedding + pos_table[0]              (row 0)
           bicubic-resized / padded patch positions     (rows 1..MAX_PATCHES)
           zeros                                        (rows SEQ..SEQ_PAD-1)
    Mirrors adapt_CLIPVisionEmbeddings.get_position_embedding('bicubic').
    Cached per (w, h); patch counts are static Python ints."""
    w = int(w_patch_num)
    h = int(h_patch_num)
    # torch: reshape (PNW, PNH, D), permute, interpolate(size=(h, w)).
    A_h = _cubic_resize_matrix(PATCH_NUM_WIDTH, h)            # [h, PNW]
    A_w = _cubic_resize_matrix(PATCH_NUM_HEIGHT, w)           # [w, PNH]
    M_patch = np.kron(A_h, A_w)                               # [h*w, PNW*PNH]

    M = np.zeros((SEQ_PAD, K_POS), dtype=np.float32)
    M[0, 0] = 1.0                                             # class embedding
    M[0, 1] = 1.0                                             # class positional row
    M[1:1 + h * w, 2:] = M_patch                              # resized patch positions
    # rows 1+h*w .. SEQ_PAD-1 stay zero == torch F.pad + our sublane padding
    return M


# --------------------------- Pallas kernel ----------------------------------
def _fused_embed_kernel(lhs_ref, rhs_ref, o_ref):
    # lhs_ref: (TM, K_PAD)   bf16  rows = flattened (image, seq) pairs,
    #                              cols = [im2col patch | pos mixing | zero pad]
    # rhs_ref: (K_PAD, HIDDEN) bf16 = [W_patch ; class_emb ; pos_table ; zero pad]
    # o_ref:   (TM, HIDDEN)  f32
    o_ref[...] = jnp.dot(lhs_ref[...], rhs_ref[...],
                         preferred_element_type=jnp.float32).astype(o_ref.dtype)


# --------------------------- JAX wrapper -------------------------------------
def extract_patches(pixel_values):
    """NCHW -> [B, num_patches, C*P*P] in Conv2d-weight-compatible order."""
    B, C, H, W = pixel_values.shape
    Hn, Wn = H // PATCH_SIZE, W // PATCH_SIZE
    x = pixel_values.reshape(B, C, Hn, PATCH_SIZE, Wn, PATCH_SIZE)
    x = jnp.transpose(x, (0, 2, 4, 1, 3, 5))                  # [B, Hn, Wn, C, P, P]
    return x.reshape(B, Hn * Wn, C * PATCH_SIZE * PATCH_SIZE)


@functools.partial(jax.jit, static_argnames=("tm",))
def _embeddings_jit(params, pixel_values, pos_rows, tm):
    B = pixel_values.shape[0]

    # ---- LHS: [B*SEQ_PAD (padded to tile), K_PAD]  bf16 -----------------
    patches = extract_patches(pixel_values)                    # [B, MAX_PATCHES, K1]
    # row 0 = zeros (cls slot), rows SEQ..SEQ_PAD-1 = zeros (sublane pad)
    patch_rows = jnp.pad(patches, ((0, 0), (1, SEQ_PAD - SEQ), (0, 0)))
    lhs = jnp.concatenate([patch_rows, pos_rows], axis=-1)     # [B, SEQ_PAD, K_TOTAL]
    lhs = jnp.pad(lhs, ((0, 0), (0, 0), (0, K_PAD - K_TOTAL))) # lane-align K

    m_total = B * SEQ_PAD
    m_pad = pl.cdiv(m_total, tm) * tm
    lhs = lhs.reshape(m_total, K_PAD)
    if m_pad != m_total:
        lhs = jnp.pad(lhs, ((0, m_pad - m_total), (0, 0)))
    lhs = lhs.astype(jnp.bfloat16)

    # ---- RHS: [K_PAD, HIDDEN] bf16 (shared across all images) ------------
    rhs = jnp.concatenate([params["patch_w"],
                           params["class_embedding"][None, :],
                           params["pos_table"]], axis=0)       # [K_TOTAL, HIDDEN]
    rhs = jnp.pad(rhs, ((0, K_PAD - K_TOTAL), (0, 0))).astype(jnp.bfloat16)

    # ---- single fused matmul over tiled M ---------------------------------
    # TODO(synk): if the downstream encoder takes bf16 activations, switch the
    # out_shape dtype to bf16 to halve writeback bytes at CLIP-L scale.
    out = pl.pallas_call(
        _fused_embed_kernel,
        out_shape=jax.ShapeDtypeStruct((m_pad, HIDDEN), jnp.float32),
        grid=(m_pad // tm,),
        in_specs=[
            pl.BlockSpec((tm, K_PAD), lambda m: (m, 0)),
            pl.BlockSpec((K_PAD, HIDDEN), lambda m: (0, 0)),
        ],
        out_specs=pl.BlockSpec((tm, HIDDEN), lambda m: (m, 0)),
        compiler_params=pltpu.CompilerParams(
            dimension_semantics=("parallel",),        # shards M tiles across v7x's 2 TCs
            vmem_limit_bytes=64 * 1024 * 1024),       # headroom for full CLIP-L scale (v5e)
    )(lhs, rhs)

    out = out[:m_total].reshape(B, SEQ_PAD, HIDDEN)[:, :SEQ, :]
    return out


def clip_vision_embeddings_forward(params, pixel_values, w_patch_num, h_patch_num):
    """adapt_CLIPVisionEmbeddings.forward(pixel_values, w_patch_num, h_patch_num)."""
    B = pixel_values.shape[0]
    # Host-side, cached per (w, h) -- no per-call numpy rebuild for repeated sizes.
    pos_rows = np.stack([_position_mixing_rows(int(w), int(h))
                         for w, h in zip(w_patch_num, h_patch_num)], axis=0)
    m_total = B * SEQ_PAD
    tm = m_total if m_total <= 512 else 256           # full block at demo size, 256-row tiles at scale
    return _embeddings_jit(params, pixel_values.astype(jnp.float32),
                           jnp.asarray(pos_rows), tm)


# ----------------------- pure-JAX reference (for checking) -------------------
def _bicubic_resize_1d(x, out_size, axis, A=-0.75):
    in_size = x.shape[axis]
    scale = in_size / out_size
    dst = jnp.arange(out_size, dtype=jnp.float32)
    src = (dst + 0.5) * scale - 0.5
    i0f = jnp.floor(src)
    t = src - i0f
    i0 = i0f.astype(jnp.int32)

    def W1(d):
        return (A + 2.0) * d ** 3 - (A + 3.0) * d ** 2 + 1.0

    def W2(d):
        return A * d ** 3 - 5.0 * A * d ** 2 + 8.0 * A * d - 4.0 * A

    weights = [W2(1.0 + t), W1(t), W1(1.0 - t), W2(2.0 - t)]
    out = jnp.zeros(x.shape[:axis] + (out_size,) + x.shape[axis + 1:], jnp.float32)
    for off, wk in zip(range(-1, 3), weights):
        idx = jnp.clip(i0 + off, 0, in_size - 1)
        gathered = jnp.take(x, idx, axis=axis)
        bshape = [1] * x.ndim
        bshape[axis] = out_size
        out = out + gathered * wk.reshape(bshape)
    return out


def _reference_position_embedding(pos_table, patch_width_num, patch_height_num):
    w = int(patch_width_num)
    h = int(patch_height_num)
    position_for_class = pos_table[0, :]
    pe = pos_table[1:, :].reshape(PATCH_NUM_WIDTH, PATCH_NUM_HEIGHT, HIDDEN)
    pe = jnp.transpose(pe, (2, 0, 1)).astype(jnp.float32)     # [D, PNW, PNH]
    pe = _bicubic_resize_1d(pe, h, axis=1)
    pe = _bicubic_resize_1d(pe, w, axis=2)
    pe = jnp.transpose(pe, (1, 2, 0)).reshape(h * w, HIDDEN)
    pe = jnp.pad(pe, ((0, MAX_PATCHES - h * w), (0, 0)))
    return jnp.concatenate([position_for_class.reshape(1, HIDDEN), pe], axis=0)


def reference_forward(params, pixel_values, w_patch_num, h_patch_num):
    B = pixel_values.shape[0]
    patches = extract_patches(pixel_values.astype(jnp.float32))
    patch_embeds = jnp.einsum("bnk,kd->bnd", patches, params["patch_w"],
                              precision=jax.lax.Precision.HIGHEST)
    class_embeds = jnp.broadcast_to(params["class_embedding"][None, None, :],
                                    (B, 1, HIDDEN))
    embeddings = jnp.concatenate([class_embeds, patch_embeds], axis=1)
    pos = jnp.stack([_reference_position_embedding(params["pos_table"], w, h)
                     for w, h in zip(w_patch_num, h_patch_num)])
    return embeddings + pos


# ------------------------- parameter init ------------------------------------
def init_params(key):
    k1, k2, k3 = jax.random.split(key, 3)

    def nrm(k, shape, std=0.02):
        return std * jax.random.normal(k, shape, jnp.float32)

    return {
        "class_embedding": nrm(k1, (HIDDEN,)),
        # flattened Conv2d weight [D, C, P, P] -> [C*P*P, D]  (bias=False)
        "patch_w": nrm(k2, (PATCH_DIM, HIDDEN)),
        "pos_table": nrm(k3, (MAX_PATCHES + 1, HIDDEN)),
    }


# ------------------------------- main ----------------------------------------
if __name__ == "__main__":
    key = jax.random.PRNGKey(0)
    pkey, xkey = jax.random.split(key)
    params = init_params(pkey)

    B = 2
    images = jax.random.normal(xkey, (B, NUM_CHANNELS, IMAGE_SIZE, IMAGE_SIZE), jnp.float32)
    # per-image effective patch-grid sizes (w_patch_num, h_patch_num)
    w_patch_num = [4, 3]
    h_patch_num = [4, 2]

    out = clip_vision_embeddings_forward(params, images, w_patch_num, h_patch_num)
    out = jax.block_until_ready(out)
    assert out.shape == (B, SEQ, HIDDEN)

    ref = jax.block_until_ready(
        reference_forward(params, images, w_patch_num, h_patch_num))
    # bf16 matmul operands, f32 accumulation -> loose-ish tolerance.
    np.testing.assert_allclose(np.asarray(out), np.asarray(ref), rtol=2e-2, atol=5e-3)

    # TODO(synk): the surrounding adapt_CLIPVisionTower / encoder stack is out of
    # scope for this module; only the embeddings forward is implemented here.
    print("KERNEL_OK")
</pallas_src>

<mosaic_0001>
module attributes {stable_mosaic.version = 11 : i64} {
  func.func @_fused_embed_kernel(%arg0: i32, %arg1: memref<48x128xbf16, #tpu.memory_space<vmem>>, %arg2: memref<128x128xbf16, #tpu.memory_space<vmem>>, %arg3: memref<48x128xf32, #tpu.memory_space<vmem>>) attributes {dimension_semantics = [#tpu.dimension_semantics<parallel>], iteration_bounds = array<i64: 1>, scalar_prefetch = 0 : i64, scratch_operands = 0 : i64, tpu.core_type = #tpu.core_type<tc>, window_params = [{transform_indices = @transform_0, window_bounds = array<i64: 48, 128>}, {pipeline_mode = #tpu.pipeline_mode<synchronous>, transform_indices = @transform_1, window_bounds = array<i64: 128, 128>}, {transform_indices = @transform_2, window_bounds = array<i64: 48, 128>}]} {
    %c0 = arith.constant 0 : index
    %c0_0 = arith.constant 0 : index
    %0 = vector.load %arg1[%c0, %c0_0] : memref<48x128xbf16, #tpu.memory_space<vmem>>, vector<48x128xbf16>
    %c0_1 = arith.constant 0 : index
    %c0_2 = arith.constant 0 : index
    %1 = vector.load %arg2[%c0_1, %c0_2] : memref<128x128xbf16, #tpu.memory_space<vmem>>, vector<128x128xbf16>
    %cst = arith.constant dense<0.000000e+00> : vector<48x128xf32>
    %2 = tpu.matmul %0, %1, %cst {dimension_numbers = #tpu.dot_dimension_numbers<[1], [0], [0], [1], [0, 0, 1, 1], [], []>} : vector<48x128xbf16>, vector<128x128xbf16>, vector<48x128xf32> -> vector<48x128xf32>
    %c0_3 = arith.constant 0 : index
    %c0_4 = arith.constant 0 : index
    %3 = vector.load %arg3[%c0_3, %c0_4] : memref<48x128xf32, #tpu.memory_space<vmem>>, vector<48x128xf32>
    tpu.vector_store %arg3[%c0_3, %c0_4], %2 {strides = array<i32>} : memref<48x128xf32, #tpu.memory_space<vmem>>, vector<48x128xf32>,
    return
  }
  func.func @transform_0(%arg0: i32) -> (i32, i32) {
    %c0_i32 = arith.constant 0 : i32
    %c0_i32_0 = arith.constant 0 : i32
    return %arg0, %c0_i32 : i32, i32
  }
  func.func @transform_1(%arg0: i32) -> (i32, i32) {
    %c0_i32 = arith.constant 0 : i32
    %c0_i32_0 = arith.constant 0 : i32
    %c0_i32_1 = arith.constant 0 : i32
    return %c0_i32, %c0_i32_0 : i32, i32
  }
  func.func @transform_2(%arg0: i32) -> (i32, i32) {
    %c0_i32 = arith.constant 0 : i32
    %c0_i32_0 = arith.constant 0 : i32
    return %arg0, %c0_i32 : i32, i32
  }
}

</mosaic_0001>

<bundles_post_ra>
// kernel: _embeddings_jit.1
= control target key start
LH: loop header
LB: loop body
LE: loop exit
PB: predicated region body
PF: predicated region fallthrough
CT: control target
= control target key end

     0   :  { %v246_v0 = vmov 0.0   ;;  %vm247_vm0 = vmmov 0   ;;  %s317_s1 = inlined_call_operand.vmem [shape: bf16[128,128], index: 1, kind: input, shape index: {}]   ;;  %s318_s0 = inlined_call_operand.vmem [shape: bf16[48,128], index: 0, kind: input, shape index: {}]   ;;  %s319_s2 = inlined_call_operand.vmem [shape: f32[48,128], index: 2, kind: output, shape index: {}]  }
   0x1   :  { %217 = vmatprep.subr.bf16.mxu1 %v246_v0  ;;  %v235_v1 = vld [vmem:[%s317_s1 + $0x38] sm:$0xff]   ;;  %189 = vmatprep.subr.bf16.mxu0 %v246_v0  ;;  %v236_v2 = vld [vmem:[%s317_s1 + $0x30] sm:$0xff]   ;;  %v237_v3 = vld [vmem:[%s317_s1 + $0x28] sm:$0xff]  }
   0x2   :  { %209 = vmatprep.mubr.msk.bf16.mxu1 %vm247_vm0, %v246_v0  ;;  %205 = vmatprep.mubr.msk.bf16.mxu0 %vm247_vm0, %v246_v0  ;;  %v238_v4 = vld [vmem:[%s317_s1 + $0x20] sm:$0xff]   ;;  %v239_v5 = vld [vmem:[%s317_s1 + $0x18] sm:$0xff]   ;;  %v240_v6 = vld [vmem:[%s317_s1 + $0x10] sm:$0xff]  }
   0x3   :  { %225 = vmatpush3.bf16.msra.mxu1 %v235_v1  ;;  %190 = vmatpush3.bf16.msra.mxu0 %v235_v1  ;;  %v241_v7 = vld [vmem:[%s317_s1 + $0x8] sm:$0xff]   ;;  %v242_v8 = vld [vmem:[%s317_s1] sm:$0xff]   ;;  %v245_v11 = vld [vmem:[%s318_s0 + $0x10] sm:$0xff]  }
   0x4   :  { %218 = vmatprep.subr.bf16.mxu1 %v246_v0  ;;  %191 = vmatprep.subr.bf16.mxu0 %v246_v0  ;;  %v243_v9 = vld [vmem:[%s318_s0 + $0x8] sm:$0xff]   ;;  %v244_v10 = vld [vmem:[%s318_s0] sm:$0xff]  }
   0x7   :  { %226 = vmatpush3.bf16.msra.mxu1 %v236_v2  ;;  %192 = vmatpush3.bf16.msra.mxu0 %v236_v2 }
   0x8   :  { %219 = vmatprep.subr.bf16.mxu1 %v246_v0  ;;  %193 = vmatprep.subr.bf16.mxu0 %v246_v0 }
   0xb   :  { %227 = vmatpush3.bf16.msra.mxu1 %v237_v3  ;;  %194 = vmatpush3.bf16.msra.mxu0 %v237_v3 }
   0xc   :  { %220 = vmatprep.subr.bf16.mxu1 %v246_v0  ;;  %195 = vmatprep.subr.bf16.mxu0 %v246_v0 }
   0xf   :  { %228 = vmatpush3.bf16.msra.mxu1 %v238_v4  ;;  %196 = vmatpush3.bf16.msra.mxu0 %v238_v4 }
  0x10   :  { %221 = vmatprep.subr.bf16.mxu1 %v246_v0  ;;  %197 = vmatprep.subr.bf16.mxu0 %v246_v0 }
  0x13   :  { %229 = vmatpush3.bf16.msra.mxu1 %v239_v5  ;;  %198 = vmatpush3.bf16.msra.mxu0 %v239_v5 }
  0x14   :  { %222 = vmatprep.subr.bf16.mxu1 %v246_v0  ;;  %199 = vmatprep.subr.bf16.mxu0 %v246_v0 }
  0x17   :  { %230 = vmatpush3.bf16.msra.mxu1 %v240_v6  ;;  %200 = vmatpush3.bf16.msra.mxu0 %v240_v6 }
  0x18   :  { %223 = vmatprep.subr.bf16.mxu1 %v246_v0  ;;  %201 = vmatprep.subr.bf16.mxu0 %v246_v0 }
  0x1b   :  { %231 = vmatpush3.bf16.msra.mxu1 %v241_v7  ;;  %202 = vmatpush3.bf16.msra.mxu0 %v241_v7 }
  0x1c   :  { %224 = vmatprep.subr.bf16.mxu1 %v246_v0  ;;  %203 = vmatprep.subr.bf16.mxu0 %v246_v0 }
  0x1f   :  { %232 = vmatpush3.bf16.msra.mxu1 %v242_v8  ;;  %204 = vmatpush3.bf16.msra.mxu0 %v242_v8 }
  0x22   :  { %210 = vmatmul.mubr.bf16.vlgmr.msra.gmra.mxu1 %v243_v9  ;;  %206 = vmatmul.mubr.bf16.vlgmr.msra.gmra.mxu0 %v244_v10 }
  0x23   :  { %213 = vmatprep.mubr.msk.bf16.mxu1 %vm247_vm0, %v246_v0 }
  0x2a   :  { %214 = vmatmul.mubr.bf16.gmra.mxu1 %v245_v11 }
  0xe2   :  { %v142_v12 = vpop.f32.mrf.mxu1  ;;  %v134_v13 = vpop.f32.mrf.mxu0 }
  0xe3   :  { %159 = vst [vmem:[%s319_s2 + $0x10] sm:$0xff] %v142_v12  ;;  %157 = vst [vmem:[%s319_s2] sm:$0xff] %v134_v13 }
  0xe4   :  { %v211_v14 = vpop.f32.mrf.mxu1  ;;  %v207_v15 = vpop.f32.mrf.mxu0 }
  0xe6   :  { %v145_v16 = vpop.f32.mrf.mxu1  ;;  %v137_v17 = vpop.f32.mrf.mxu0 }
  0xe7   :  { %160 = vst [vmem:[%s319_s2 + $0x18] sm:$0xff] %v145_v16  ;;  %158 = vst [vmem:[%s319_s2 + $0x8] sm:$0xff] %v137_v17 }
  0xe8   :  { %v212_v18 = vpop.f32.mrf.mxu1  ;;  %v208_v19 = vpop.f32.mrf.mxu0 }
  0xea   :  { %v150_v20 = vpop.f32.mrf.mxu1 }
  0xeb   :  { %161 = vst [vmem:[%s319_s2 + $0x20] sm:$0xff] %v150_v20 }
  0xec   :  { %v215_v21 = vpop.f32.mrf.mxu1 }
  0xee   :  { %v153_v22 = vpop.f32.mrf.mxu1 }
  0xef   :  { %162 = vst [vmem:[%s319_s2 + $0x28] sm:$0xff] %v153_v22 }
  0xf0   :  { %v216_v23 = vpop.f32.mrf.mxu1 }

</bundles_post_ra>
